<compile_context>
chip_gen: v7x
topology: tpu7x:2x2x1
jax: 0.10.0
libtpu: 0.0.40
codegen_flags: <defaults>
</compile_context>

<pallas_src>
import functools

import jax
import jax.numpy as jnp
from jax.experimental import pallas as pl
from jax.experimental.pallas import tpu as pltpu

_HIDDEN = 256


def _cdiv(a, b):
    return (a + b - 1) // b


def _round_up(v, m):
    return (v + m - 1) // m * m


def _mlp_kernel(x_ref, w1_ref, b1_ref, w2_ref, b2_ref, o_ref):
    # Cast the streamed x tile to bf16 in-kernel (VPU work, hidden under DMA/MXU).
    x_bf = x_ref[...].astype(jnp.bfloat16)
    # fc1: (TB, D_in) bf16 @ (D_in, 256) bf16 -> f32 accumulate on the MXU.
    h = jnp.dot(x_bf, w1_ref[...], preferred_element_type=jnp.float32)
    # bias add + ReLU in f32.
    h = jnp.maximum(h + b1_ref[...], 0.0)
    # dropout (eval mode) -> identity.
    # fc2: (TB, 256) bf16 @ (256, D_out) bf16 -> f32 accumulate.
    out = jnp.dot(h.astype(jnp.bfloat16), w2_ref[...],
                  preferred_element_type=jnp.float32)
    o_ref[...] = (out + b2_ref[...]).astype(o_ref.dtype)


def prepare_params(w1, b1, w2, b2):
    """One-time parameter prep (call OUTSIDE the per-step forward).

    Weights -> bf16 (MXU-native), biases -> f32 row vectors.  Doing this once
    avoids a full read+write re-cast pass over the weights on every call.
    """
    return (w1.astype(jnp.bfloat16),
            b1.reshape(1, -1).astype(jnp.float32),
            w2.astype(jnp.bfloat16),
            b2.reshape(1, -1).astype(jnp.float32))


@functools.partial(jax.jit, static_argnames=("block_b",))
def advanced_nn_forward(x, w1_bf, b1_2d, w2_bf, b2_2d, *, block_b=1024):
    """Fused fc1 -> relu -> (eval dropout) -> fc2.

    x     : (B, D_in)   float32
    w1_bf : (D_in, 256) bfloat16     b1_2d : (1, 256)   float32
    w2_bf : (256, D_out) bfloat16    b2_2d : (1, D_out) float32
    returns (B, D_out) float32
    """
    B, d_in = x.shape
    hidden = w1_bf.shape[1]
    d_out = w2_bf.shape[1]

    # --- batch tile selection -------------------------------------------------
    # At least 2 grid steps when B allows (lets the "parallel" axis shard over
    # both v7x TensorCores); tile derived from B so a batch slightly above
    # block_b is not ~2x over-padded.  Ragged last tile handled by Pallas.
    num_tiles = max(2, _cdiv(B, block_b))
    tb = max(8, min(block_b, _round_up(_cdiv(B, num_tiles), 8)))

    # --- VMEM audit -----------------------------------------------------------
    # Resident (constant index_map) weights (double-buffered by default) plus
    # double-buffered x / out tiles must fit the scoped VMEM limit.
    def vmem_bytes(tb_):
        w = 2 * (w1_bf.size * 2 + w2_bf.size * 2 + b1_2d.size * 4 + b2_2d.size * 4)
        return w + 2 * tb_ * d_in * 4 + 2 * tb_ * d_out * 4

    vmem_budget = 48 * 1024 * 1024          # conservative under v7x's 64 MiB physical
    while tb > 8 and vmem_bytes(tb) > vmem_budget:
        tb = max(8, _round_up(tb // 2, 8))
    vmem_limit = int(min(56 * 1024 * 1024,
                         max(32 * 1024 * 1024, vmem_bytes(tb) + (4 << 20))))

    grid = (_cdiv(B, tb),)

    cost = pl.CostEstimate(
        flops=2 * B * (d_in * hidden + hidden * d_out),
        transcendentals=0,
        bytes_accessed=(x.size * 4 + w1_bf.size * 2 + w2_bf.size * 2
                        + b1_2d.size * 4 + b2_2d.size * 4 + B * d_out * 4),
    )

    return pl.pallas_call(
        _mlp_kernel,
        out_shape=jax.ShapeDtypeStruct((B, d_out), jnp.float32),
        grid=grid,
        in_specs=[
            # x: streamed per batch tile at its true inner dim (no 128-padding;
            # a block dim may equal the full array dim, Mosaic tiles internally).
            pl.BlockSpec((tb, d_in), lambda i: (i, 0)),
            # Weights / biases: constant index_map -> DMA'd once, stay in VMEM.
            pl.BlockSpec((d_in, hidden), lambda i: (0, 0)),
            pl.BlockSpec((1, hidden), lambda i: (0, 0)),
            pl.BlockSpec((hidden, d_out), lambda i: (0, 0)),
            pl.BlockSpec((1, d_out), lambda i: (0, 0)),
        ],
        # Output kept at its true (B, D_out) shape: no lane padding and no
        # post-kernel slice pass.  (bf16 output is a further option if the
        # consumer also runs in bf16.)
        out_specs=pl.BlockSpec((tb, d_out), lambda i: (i, 0)),
        compiler_params=pltpu.CompilerParams(
            dimension_semantics=("parallel",),
            vmem_limit_bytes=vmem_limit,
        ),
        cost_estimate=cost,
    )(x, w1_bf, b1_2d, w2_bf, b2_2d)


def init_params(key, input_size, output_size, hidden=_HIDDEN):
    """Deterministic PyTorch-style Linear init: U(-1/sqrt(fan_in), 1/sqrt(fan_in))."""
    k1, k2, k3, k4 = jax.random.split(key, 4)
    bound1 = 1.0 / jnp.sqrt(input_size)
    bound2 = 1.0 / jnp.sqrt(hidden)
    w1 = jax.random.uniform(k1, (input_size, hidden), jnp.float32, -bound1, bound1)
    b1 = jax.random.uniform(k2, (hidden,), jnp.float32, -bound1, bound1)
    w2 = jax.random.uniform(k3, (hidden, output_size), jnp.float32, -bound2, bound2)
    b2 = jax.random.uniform(k4, (output_size,), jnp.float32, -bound2, bound2)
    return w1, b1, w2, b2


if __name__ == "__main__":
    key = jax.random.PRNGKey(0)
    k_x, k_x2, k_p = jax.random.split(key, 3)

    input_size, output_size = 32, 16
    w1, b1, w2, b2 = init_params(k_p, input_size, output_size)
    params = prepare_params(w1, b1, w2, b2)   # one-time bf16 conversion

    def ref_fwd(x):   # eval-mode dropout = identity
        return jnp.maximum(x @ w1 + b1, 0.0) @ w2 + b2

    # Small single-tile case (B=2).
    x = jax.random.normal(k_x, (2, input_size), dtype=jnp.float32)
    out = jax.block_until_ready(advanced_nn_forward(x, *params))
    assert out.shape == (2, output_size)
    assert jnp.allclose(out, ref_fwd(x), atol=5e-2, rtol=5e-2), (
        f"max abs err {jnp.max(jnp.abs(out - ref_fwd(x)))}")

    # Multi-tile + ragged-last-tile case (grid of 2, partial final block).
    x2 = jax.random.normal(k_x2, (40, input_size), dtype=jnp.float32)
    out2 = jax.block_until_ready(advanced_nn_forward(x2, *params))
    assert out2.shape == (40, output_size)
    assert jnp.allclose(out2, ref_fwd(x2), atol=5e-2, rtol=5e-2), (
        f"max abs err {jnp.max(jnp.abs(out2 - ref_fwd(x2)))}")

    print("KERNEL_OK")
</pallas_src>

<mosaic_0001>
module attributes {stable_mosaic.version = 11 : i64} {
  func.func @_mlp_kernel(%arg0: i32, %arg1: memref<8x32xf32, #tpu.memory_space<vmem>>, %arg2: memref<32x256xbf16, #tpu.memory_space<vmem>>, %arg3: memref<1x256xf32, #tpu.memory_space<vmem>>, %arg4: memref<256x16xbf16, #tpu.memory_space<vmem>>, %arg5: memref<1x16xf32, #tpu.memory_space<vmem>>, %arg6: memref<8x16xf32, #tpu.memory_space<vmem>>) attributes {dimension_semantics = [#tpu.dimension_semantics<parallel>], iteration_bounds = array<i64: 1>, scalar_prefetch = 0 : i64, scratch_operands = 0 : i64, tpu.core_type = #tpu.core_type<tc>, window_params = [{transform_indices = @transform_0, window_bounds = array<i64: 8, 32>}, {pipeline_mode = #tpu.pipeline_mode<synchronous>, transform_indices = @transform_1, window_bounds = array<i64: 32, 256>}, {pipeline_mode = #tpu.pipeline_mode<synchronous>, transform_indices = @transform_2, window_bounds = array<i64: 1, 256>}, {pipeline_mode = #tpu.pipeline_mode<synchronous>, transform_indices = @transform_3, window_bounds = array<i64: 256, 16>}, {pipeline_mode = #tpu.pipeline_mode<synchronous>, transform_indices = @transform_4, window_bounds = array<i64: 1, 16>}, {transform_indices = @transform_5, window_bounds = array<i64: 8, 16>}]} {
    %c0 = arith.constant 0 : index
    %c0_0 = arith.constant 0 : index
    %0 = vector.load %arg1[%c0, %c0_0] : memref<8x32xf32, #tpu.memory_space<vmem>>, vector<8x32xf32>
    %1 = arith.truncf %0 : vector<8x32xf32> to vector<8x32xbf16>
    %c0_1 = arith.constant 0 : index
    %c0_2 = arith.constant 0 : index
    %2 = vector.load %arg2[%c0_1, %c0_2] : memref<32x256xbf16, #tpu.memory_space<vmem>>, vector<32x256xbf16>
    %cst = arith.constant dense<0.000000e+00> : vector<8x256xf32>
    %3 = tpu.matmul %1, %2, %cst {dimension_numbers = #tpu.dot_dimension_numbers<[1], [0], [0], [1], [0, 0, 1, 1], [], []>} : vector<8x32xbf16>, vector<32x256xbf16>, vector<8x256xf32> -> vector<8x256xf32>
    %c0_3 = arith.constant 0 : index
    %c0_4 = arith.constant 0 : index
    %4 = vector.load %arg3[%c0_3, %c0_4] : memref<1x256xf32, #tpu.memory_space<vmem>>, vector<1x256xf32>
    %5 = vector.broadcast %4 : vector<1x256xf32> to vector<8x256xf32>
    %6 = arith.addf %3, %5 : vector<8x256xf32>
    %cst_5 = arith.constant 0.000000e+00 : f32
    %7 = vector.broadcast %cst_5 : f32 to vector<8x256xf32>
    %8 = arith.maximumf %6, %7 : vector<8x256xf32>
    %9 = arith.truncf %8 : vector<8x256xf32> to vector<8x256xbf16>
    %c0_6 = arith.constant 0 : index
    %c0_7 = arith.constant 0 : index
    %10 = vector.load %arg4[%c0_6, %c0_7] : memref<256x16xbf16, #tpu.memory_space<vmem>>, vector<256x16xbf16>
    %cst_8 = arith.constant dense<0.000000e+00> : vector<8x16xf32>
    %11 = tpu.matmul %9, %10, %cst_8 {dimension_numbers = #tpu.dot_dimension_numbers<[1], [0], [0], [1], [0, 0, 1, 1], [], []>} : vector<8x256xbf16>, vector<256x16xbf16>, vector<8x16xf32> -> vector<8x16xf32>
    %c0_9 = arith.constant 0 : index
    %c0_10 = arith.constant 0 : index
    %12 = vector.load %arg5[%c0_9, %c0_10] : memref<1x16xf32, #tpu.memory_space<vmem>>, vector<1x16xf32>
    %13 = vector.broadcast %12 : vector<1x16xf32> to vector<8x16xf32>
    %14 = arith.addf %11, %13 : vector<8x16xf32>
    %c0_11 = arith.constant 0 : index
    %c0_12 = arith.constant 0 : index
    %15 = vector.load %arg6[%c0_11, %c0_12] : memref<8x16xf32, #tpu.memory_space<vmem>>, vector<8x16xf32>
    tpu.vector_store %arg6[%c0_11, %c0_12], %14 {strides = array<i32>} : memref<8x16xf32, #tpu.memory_space<vmem>>, vector<8x16xf32>,
    return
  }
  func.func @transform_0(%arg0: i32) -> (i32, i32) {
    %c0_i32 = arith.constant 0 : i32
    %c0_i32_0 = arith.constant 0 : i32
    return %arg0, %c0_i32 : i32, i32
  }
  func.func @transform_1(%arg0: i32) -> (i32, i32) {
    %c0_i32 = arith.constant 0 : i32
    %c0_i32_0 = arith.constant 0 : i32
    %c0_i32_1 = arith.constant 0 : i32
    return %c0_i32, %c0_i32_0 : i32, i32
  }
  func.func @transform_2(%arg0: i32) -> (i32, i32) {
    %c0_i32 = arith.constant 0 : i32
    %c0_i32_0 = arith.constant 0 : i32
    %c0_i32_1 = arith.constant 0 : i32
    return %c0_i32, %c0_i32_0 : i32, i32
  }
  func.func @transform_3(%arg0: i32) -> (i32, i32) {
    %c0_i32 = arith.constant 0 : i32
    %c0_i32_0 = arith.constant 0 : i32
    %c0_i32_1 = arith.constant 0 : i32
    return %c0_i32, %c0_i32_0 : i32, i32
  }
  func.func @transform_4(%arg0: i32) -> (i32, i32) {
    %c0_i32 = arith.constant 0 : i32
    %c0_i32_0 = arith.constant 0 : i32
    %c0_i32_1 = arith.constant 0 : i32
    return %c0_i32, %c0_i32_0 : i32, i32
  }
  func.func @transform_5(%arg0: i32) -> (i32, i32) {
    %c0_i32 = arith.constant 0 : i32
    %c0_i32_0 = arith.constant 0 : i32
    return %arg0, %c0_i32 : i32, i32
  }
}

</mosaic_0001>

<bundles_post_ra>
// kernel: advanced_nn_forward.1
= control target key start
LH: loop header
LB: loop body
LE: loop exit
PB: predicated region body
PF: predicated region fallthrough
CT: control target
= control target key end

     0   :  { %10 = vsyncpa [#allocation3], 0  ;;  %v396_v2 = vmov 0   ;;  %vm60_vm0 = vcmask 261120   ;;  %v30_v23 = vlaneseq  ;;  %vm284_vm1 = vcmask 130048   ;;  %s511_s0 = inlined_call_operand.vmem [shape: f32[2,32], index: 0, kind: input, shape index: {}]   ;;  %s512_s1 = inlined_call_operand.vmem [shape: bf16[32,256], index: 1, kind: input, shape index: {}]   ;;  %s513_s2 = inlined_call_operand.vmem [shape: f32[1,256], index: 2, kind: input, shape index: {}]   ;;  %s514_s3 = inlined_call_operand.vmem [shape: bf16[256,16], index: 3, kind: input, shape index: {}]   ;;  %s515_s4 = inlined_call_operand.vmem [shape: f32[1,16], index: 4, kind: input, shape index: {}]   ;;  %s516_s5 = inlined_call_operand.hbm [shape: f32[2,16], index: 5, kind: output, shape index: {}]  }
   0x1   :  { %v350_v0 = vld [vmem:[%s512_s1 + $0x4] ss:$8 sps:$4 sm:$0xff]   ;;  %v352_v1 = vld [vmem:[%s512_s1] ss:$8 sps:$4 sm:$0xff]   ;;  %96 = vmatprep.mubr.bf16.mxu0 %v396_v2  ;;  %v353_v3 = vld [vmem:[%s512_s1 + $0x14] ss:$8 sps:$4 sm:$0xff]  }
   0x2   :  { %v355_v4 = vld [vmem:[%s512_s1 + $0x10] ss:$8 sps:$4 sm:$0xff]   ;;  %64 = vmatprep.subr.bf16.mxu0 %v350_v0  ;;  %v22_v5 = vld [vmem:[%s511_s0] sm:$0xff]  ;;  %v358_v8 = vld [vmem:[%s514_s3 + $0x48] sm:$0xff]   ;;  %v31_v24 = vshrl.u32 %v30_v23, 7 }
   0x3   :  { %65 = vmatpush1.bf16.msra.mxu0 %v352_v1  ;;  %v356_v6 = vld [vmem:[%s514_s3 + $0x40] sm:$0xff]   ;;  %v23_v9 = vpack.c.bf16 %v22_v5, %v22_v5  ;;  %v359_v10 = vld [vmem:[%s514_s3 + $0x8] sm:$0xff]   ;;  %v360_v11 = vld [vmem:[%s514_s3 + $0x50] sm:$0xff]  }
   0x4   :  { %66 = vmatprep.subr.bf16.mxu0 %v353_v3  ;;  %v357_v7 = vld [vmem:[%s514_s3] sm:$0xff]   ;;  %324 = vmatprep.subr.bf16.mxu1 %v356_v6  ;;  %v361_v12 = vld [vmem:[%s514_s3 + $0x10] sm:$0xff]   ;;  %v362_v13 = vld [vmem:[%s514_s3 + $0x58] sm:$0xff]   ;;  %v32_v25 = vsub.s32 0, %v31_v24  ;;  %v36_v27 = vsub.s32 1, %v31_v24 }
   0x5   :  { %325 = vmatpush3.bf16.msra.mxu1 %v357_v7  ;;  %v363_v14 = vld [vmem:[%s514_s3 + $0x18] sm:$0xff]   ;;  %v364_v15 = vld [vmem:[%s514_s3 + $0x60] sm:$0xff]   ;;  %v366_v17 = vld [vmem:[%s514_s3 + $0x68] sm:$0xff]  }
   0x6   :  { %326 = vmatprep.subr.bf16.mxu1 %v358_v8  ;;  %v365_v16 = vld [vmem:[%s514_s3 + $0x20] sm:$0xff]   ;;  %v367_v18 = vld [vmem:[%s514_s3 + $0x28] sm:$0xff]   ;;  %v368_v19 = vld [vmem:[%s514_s3 + $0x70] sm:$0xff]  }
   0x7   :  { %67 = vmatpush1.bf16.msra.mxu0 %v355_v4  ;;  %v369_v20 = vld [vmem:[%s514_s3 + $0x30] sm:$0xff]   ;;  %v370_v21 = vld [vmem:[%s514_s3 + $0x78] sm:$0xff]   ;;  %v28_v26 = vld [vmem:[%s513_s2] sm:$0x3] }
   0x8   :  { %v371_v22 = vld [vmem:[%s514_s3 + $0x38] sm:$0xff]   ;;  %v33_v28 = vrot.slane %v28_v26, %v32_v25  ;;  %v37_v29 = vrot.slane %v28_v26, %v36_v27  ;;  %v307_v41 = vld [vmem:[%s515_s4] ss:$0 sm:$0xff] }
   0x9   :  { %327 = vmatpush3.bf16.msra.mxu1 %v359_v10 }
   0xa   :  { %306 = vmatmul.mubr.msk.bf16.vlgmr.msra.gmra.mrb[0].mxu0 %vm60_vm0, %v23_v9  ;;  %328 = vmatprep.subr.bf16.mxu1 %v360_v11 }
   0xd   :  { %329 = vmatpush3.bf16.msra.mxu1 %v361_v12 }
   0xe   :  { %330 = vmatprep.subr.bf16.mxu1 %v362_v13 }
  0x11   :  { %331 = vmatpush3.bf16.msra.mxu1 %v363_v14 }
  0x12   :  { %332 = vmatprep.subr.bf16.mxu1 %v364_v15 }
  0x15   :  { %333 = vmatpush3.bf16.msra.mxu1 %v365_v16 }
  0x16   :  { %334 = vmatprep.subr.bf16.mxu1 %v366_v17 }
  0x19   :  { %335 = vmatpush3.bf16.msra.mxu1 %v367_v18 }
  0x1a   :  { %336 = vmatprep.subr.bf16.mxu1 %v368_v19 }
  0x1d   :  { %337 = vmatpush3.bf16.msra.mxu1 %v369_v20 }
  0x1e   :  { %338 = vmatprep.subr.bf16.mxu1 %v370_v21 }
  0x21   :  { %339 = vmatpush3.bf16.msra.mxu1 %v371_v22 }
  0xdd   :  { %v98_v30 = vpop.f32.mrb[0].mxu0 }
  0xde   :  { %v99_v31 = vadd.f32 %v98_v30, %v33_v28  ;;  %v100_v32 = vpop.f32.mrb[1].mxu0 }
  0xdf   :  { %v101_v33 = vadd.f32 %v100_v32, %v37_v29  ;;  %v102_v34 = vpop.f32.mrb[2].mxu0 }
  0xe0   :  { %v105_v35 = vmax.f32 %v99_v31, 0.0  ;;  %v103_v36 = vpop.f32.mrb[3].mxu0 }
  0xe1   :  { %v106_v37 = vmax.f32 %v101_v33, 0.0 }
  0xe2   :  { %v107_v39 = vpack.c.bf16 %v105_v35, %v105_v35 }
  0xe3   :  { %v108_v38 = vpack.c.bf16 %v106_v37, %v106_v37 }
  0xe5   :  { %276 = vmatprep.mubr.bf16.mxu1 %v108_v38 }
  0xe6   :  { %277 = vmatmul.mubr.bf16.vlgmr.msra.gmra.mrb[0].mxu1 %v107_v39 }
 0x1b9   :  { %v340_v40 = vpop.f32.mrb[0].mxu1 }
 0x1ba   :  { %v341_v42 = vpop.f32.mrb[1].mxu1 }
 0x1bb   :  { %v342_v43 = vadd.f32 %v341_v42, %v340_v40  ;;  %v343_v44 = vpop.f32.mrb[2].mxu1 }
 0x1bc   :  { %v344_v45 = vpop.f32.mrb[3].mxu1 }
 0x1bd   :  { %v279_v46 = vadd.f32 %v342_v43, %v307_v41 }
 0x1bf   :  { %285 = vst.msk [vmem:[#allocation2] sm:$0xff] %vm284_vm1, %v279_v46 }
 0x1c0   :  { %290 = vsyncadd [#allocation3], 96  ;;  %s397_s2 = smov [#allocation2]  }
 0x1c1   :  { %s291_s0 = sshll.u32 %s397_s2, 4  ;;  %s292_s0 = int_to_ptr.vmem [resolvable:$true] %s291_s0 }
 0x1c2   :  { %s372_s10 = scalar_lea.vmem %s292_s0, 32  ;;  %s376_s11 = scalar_lea.vmem %s292_s0, 128 }
 0x1c3   :  { %p373_p0 = scmp.ne.s32.totalorder %s292_s0, %s372_s10  ;;  %p377_p1 = scmp.lt.s32.totalorder %s292_s0, %s292_s0 }
 0x1c4   :  { %p378_p2 = scmp.lt.s32.totalorder %s376_s11, %s372_s10 }
 0x1c6   :  { %p379_p3 = por %p378_p2, %p377_p1 }
 0x1c8   :  { %p380_p4 = pnand %p379_p3, %p373_p0 }
 0x1ca   :  { %383 = shalt.err (!%p380_p4)
}
 0x1cb   :  { %s384_s13 = scalar_lea.hbm %s516_s5, 32 }
 0x1cc   :  { %p385_p5 = scmp.ne.s32.totalorder %s516_s5, %s384_s13  ;;  %p388_p6 = scmp.lt.u32.totalorder %s384_s13, %s516_s5 }
 0x1ce   :  { %p390_p7 = pnand %p388_p6, %p385_p5 }
 0x1d0   :  { %393 = shalt.err (!%p390_p7)
}
 0x1d1   :  { %s398_s18 = smov 32   ;;  %s399_s19 = smov 2  }
 0x1d2   :  { %297 = dma.vmem_to_hbm [thread:$0]  %s292_s0, 32, %s516_s5, [#allocation3], %s398_s18, %s398_s18, %s399_s19  }
 0x1d3   :  { %394 = dma.done.wait [#allocation3], 128  }
 0x1d4   :  { %395 = vsyncadd [#allocation3], 4294967168 }
 0x1d5   :  { %301 = vsyncpa [#allocation3], 1 }

</bundles_post_ra>
